<compile_context>
chip_gen: v7x
topology: tpu7x:2x2x1
jax: 0.10.0
libtpu: 0.0.40
codegen_flags: <defaults>
</compile_context>

<pallas_src>
import functools

import jax
import jax.numpy as jnp
from jax.experimental import pallas as pl
from jax.experimental.pallas import tpu as pltpu


# --------------------------------------------------------------------------
# Kernel 1: filter-generating network (runs once, shared by every CRF repeat)
#   W_e = (ReLU(ef_e @ fw1 + fb1) @ fw2 + fb2) * (1 / deg(dst_e))
# Edge-tiled grid, "parallel" semantics (shardable across v7x TensorCores).
# Output stored in bf16: halves the HBM bytes the CRF kernel streams per edge.
# --------------------------------------------------------------------------
def _fnet_kernel(ef_ref, scale_ref, fw1_ref, fb1_ref, fw2_ref, fb2_ref, w_ref):
    h1 = jnp.dot(ef_ref[...], fw1_ref[...],
                 preferred_element_type=jnp.float32) + fb1_ref[...]
    h1 = jnp.maximum(h1, 0.0)
    w = jnp.dot(h1, fw2_ref[...],
                preferred_element_type=jnp.float32) + fb2_ref[...]
    # fold the scatter-mean normalization (1/deg of this edge's destination)
    w_ref[...] = (w * scale_ref[...]).astype(w_ref.dtype)


def fnet_forward(edgefeats, edge_scale, params, nc, *, et=16):
    e, fdim = edgefeats.shape
    fhid = params["fw1"].shape[1]
    full = lambda i: (0, 0)
    return pl.pallas_call(
        _fnet_kernel,
        out_shape=jax.ShapeDtypeStruct((e, nc * nc), jnp.bfloat16),
        grid_spec=pltpu.PrefetchScalarGridSpec(
            num_scalar_prefetch=0,
            grid=(pl.cdiv(e, et),),
            in_specs=[
                pl.BlockSpec((et, fdim), lambda i: (i, 0)),
                pl.BlockSpec((et, 1), lambda i: (i, 0)),
                pl.BlockSpec((fdim, fhid), full),
                pl.BlockSpec((1, fhid), full),
                pl.BlockSpec((fhid, nc * nc), full),
                pl.BlockSpec((1, nc * nc), full),
            ],
            out_specs=pl.BlockSpec((et, nc * nc), lambda i: (i, 0)),
        ),
        compiler_params=pltpu.CompilerParams(dimension_semantics=("parallel",)),
    )(edgefeats, edge_scale,
      params["fw1"], params["fb1"], params["fw2"], params["fb2"])


# --------------------------------------------------------------------------
# Kernel 2: row-wise softmax (initial Q = softmax(input)), node-tiled.
# --------------------------------------------------------------------------
def _softmax_kernel(x_ref, o_ref):
    x = x_ref[...]                                   # (nt, 1, nc)
    m = jnp.max(x, axis=-1, keepdims=True)
    ex = jnp.exp(x - m)
    o_ref[...] = ex / jnp.sum(ex, axis=-1, keepdims=True)


def _softmax_rows(x3, *, nt=8):
    n, _, nc = x3.shape
    return pl.pallas_call(
        _softmax_kernel,
        out_shape=jax.ShapeDtypeStruct((n, 1, nc), jnp.float32),
        grid_spec=pltpu.PrefetchScalarGridSpec(
            num_scalar_prefetch=0,
            grid=(pl.cdiv(n, nt),),
            in_specs=[pl.BlockSpec((nt, 1, nc), lambda i: (i, 0, 0))],
            out_specs=pl.BlockSpec((nt, 1, nc), lambda i: (i, 0, 0)),
        ),
        compiler_params=pltpu.CompilerParams(dimension_semantics=("parallel",)),
    )(x3)


# --------------------------------------------------------------------------
# Kernel 3: one CRF repeat.
# Grid over edges SORTED BY dst; scalar-prefetched src/dst/widx drive
# data-dependent index_maps (gather Q[src_e], weight W[widx_e], write row dst_e).
# Segment sum lives in a VMEM accumulator with pl.when init/finalize; the
# finalize also applies  Q_new = input - prop  (+ softmax on non-final repeats).
# --------------------------------------------------------------------------
def _crf_step_kernel(src_ref, dst_ref, widx_ref,     # scalar-prefetch (SMEM)
                     q_ref, u_ref, w_ref,            # inputs
                     out_ref,                        # output
                     acc_ref,                        # VMEM scratch (1, nc) f32
                     *, apply_softmax):
    e = pl.program_id(0)
    ne = pl.num_programs(0)
    d = dst_ref[e]
    d_prev = dst_ref[jnp.maximum(e - 1, 0)]
    d_next = dst_ref[jnp.minimum(e + 1, ne - 1)]
    is_first = jnp.logical_or(e == 0, d != d_prev)       # first edge of this dst segment
    is_last = jnp.logical_or(e == ne - 1, d != d_next)   # last edge of this dst segment

    @pl.when(is_first)
    def _():
        acc_ref[...] = jnp.zeros_like(acc_ref)

    # message for this edge:  Q[src_e] @ (W_e / deg(dst_e))   -- (1,nc) @ (nc,nc)
    q_row = q_ref[...][0].astype(jnp.bfloat16)            # (1, nc)  bf16 MXU operand
    w_e = w_ref[...][0]                                   # (nc, nc) bf16
    acc_ref[...] += jnp.dot(q_row, w_e, preferred_element_type=jnp.float32)

    @pl.when(is_last)
    def _():
        q_new = u_ref[...][0] - acc_ref[...]              # (1, nc): input - prop
        if apply_softmax:                                 # every repeat except the last
            m = jnp.max(q_new, axis=-1, keepdims=True)
            ex = jnp.exp(q_new - m)
            q_new = ex / jnp.sum(ex, axis=-1, keepdims=True)
        out_ref[...] = q_new[None]                        # (1, 1, nc)


def _crf_step(src_s, dst_s, widx_s, q3, u3, w_all, *, apply_softmax):
    n, _, nc = q3.shape
    e_pad = dst_s.shape[0]
    kernel = functools.partial(_crf_step_kernel, apply_softmax=apply_softmax)
    return pl.pallas_call(
        kernel,
        out_shape=jax.ShapeDtypeStruct((n, 1, nc), jnp.float32),
        grid_spec=pltpu.PrefetchScalarGridSpec(
            num_scalar_prefetch=3,                       # src_s, dst_s, widx_s -> SMEM
            grid=(e_pad,),
            in_specs=[
                pl.BlockSpec((1, 1, nc), lambda e, src, dst, widx: (src[e], 0, 0)),
                pl.BlockSpec((1, 1, nc), lambda e, src, dst, widx: (dst[e], 0, 0)),
                pl.BlockSpec((1, nc, nc), lambda e, src, dst, widx: (widx[e], 0, 0)),
            ],
            out_specs=pl.BlockSpec((1, 1, nc), lambda e, src, dst, widx: (dst[e], 0, 0)),
            scratch_shapes=[pltpu.VMEM((1, nc), jnp.float32)],
        ),
        # segment accumulation requires sequential edge order
        compiler_params=pltpu.CompilerParams(dimension_semantics=("arbitrary",)),
    )(src_s, dst_s, widx_s, q3, u3, w_all)


# --------------------------------------------------------------------------
# Forward wrapper (index bookkeeping = O(E) plain-JAX glue, compute = Pallas)
# --------------------------------------------------------------------------
def ecc_crf_forward(inp, edgefeats, src, dst, params, *, nrepeats=1):
    n, nc = inp.shape
    e = src.shape[0]

    # --- glue: degrees, 1/deg per edge, edge order grouped by destination ---
    deg = jnp.zeros((n,), jnp.float32).at[dst].add(1.0)
    inv_deg = 1.0 / jnp.maximum(deg, 1.0)
    edge_scale = inv_deg[dst][:, None]                              # (E, 1)

    # one zero-weight self-edge per node: every node owns a segment, so
    # isolated nodes still get prop = 0 (matches the deg>=1 clamp).
    node_ids = jnp.arange(n, dtype=jnp.int32)
    src_all = jnp.concatenate([src.astype(jnp.int32), node_ids])
    dst_all = jnp.concatenate([dst.astype(jnp.int32), node_ids])
    widx_all = jnp.concatenate([jnp.arange(e, dtype=jnp.int32),
                                jnp.full((n,), e, dtype=jnp.int32)])
    perm = jnp.argsort(dst_all)                                     # group edges by dst
    src_s = src_all[perm]
    dst_s = dst_all[perm]
    widx_s = widx_all[perm]

    # --- filter network: per-edge (nc, nc) matrices, pre-scaled by 1/deg(dst) ---
    w_flat = fnet_forward(edgefeats, edge_scale, params, nc)        # (E, nc*nc) bf16
    w_all = jnp.concatenate(
        [w_flat.reshape(e, nc, nc),
         jnp.zeros((1, nc, nc), jnp.bfloat16)], axis=0)             # index E = zero block (self-edges)

    # --- CRF recursion ---
    u3 = inp.reshape(n, 1, nc)                                      # unaries
    q3 = _softmax_rows(u3)                                          # Q = softmax(input)
    for i in range(nrepeats):
        q3 = _crf_step(src_s, dst_s, widx_s, q3, u3, w_all,
                       apply_softmax=(i < nrepeats - 1))
    return q3.reshape(n, nc)


# --------------------------------------------------------------------------
# pure-JAX reference (f32)
# --------------------------------------------------------------------------
def _reference(inp, edgefeats, src, dst, params, *, nrepeats=1):
    n, nc = inp.shape
    e = src.shape[0]
    h1 = jax.nn.relu(edgefeats @ params["fw1"] + params["fb1"])
    w = (h1 @ params["fw2"] + params["fb2"]).reshape(e, nc, nc)
    deg = jnp.zeros((n,), jnp.float32).at[dst].add(1.0)
    q = jax.nn.softmax(inp, axis=1)
    for i in range(nrepeats):
        msg = jnp.einsum("ec,eco->eo", q[src], w)                   # ECC propagation
        summed = jnp.zeros((n, nc), jnp.float32).at[dst].add(msg)
        prop = summed / jnp.maximum(deg, 1.0)[:, None]
        q = inp - prop
        if i < nrepeats - 1:
            q = jax.nn.softmax(q, axis=1)
    return q


# --------------------------------------------------------------------------
if __name__ == "__main__":
    N, E, nc, fdim, fhid, nrepeats = 16, 48, 32, 8, 16, 2

    key = jax.random.PRNGKey(0)
    k_in, k_ef, k1, k2, k3 = jax.random.split(key, 5)

    # small deterministic graph; node N-1 has no in-edges (exercises isolated-node path)
    dst = (jnp.arange(E, dtype=jnp.int32) % (N - 1)).astype(jnp.int32)
    src = ((jnp.arange(E, dtype=jnp.int32) * 7 + 3) % N).astype(jnp.int32)

    inp = jax.random.normal(k_in, (N, nc), dtype=jnp.float32)
    edgefeats = jax.random.normal(k_ef, (E, fdim), dtype=jnp.float32)

    params = {
        # filter_net: Linear(fdim, fhid) -> ReLU -> Linear(fhid, nc*nc) (2D matrix per edge)
        "fw1": jax.random.normal(k1, (fdim, fhid), jnp.float32) * 0.3,
        "fb1": jnp.zeros((1, fhid), jnp.float32),
        "fw2": jax.random.normal(k2, (fhid, nc * nc), jnp.float32) * 0.3,
        "fb2": jax.random.normal(k3, (1, nc * nc), jnp.float32) * 0.05,
    }

    out = ecc_crf_forward(inp, edgefeats, src, dst, params, nrepeats=nrepeats)
    out = jax.block_until_ready(out)

    ref = _reference(inp, edgefeats, src, dst, params, nrepeats=nrepeats)
    assert out.shape == (N, nc)
    max_err = float(jnp.max(jnp.abs(out - ref)))
    # tolerance accounts for bf16 storage of W and bf16 MXU operands (f32 accumulation)
    assert jnp.allclose(out, ref, atol=2e-2, rtol=2e-2), f"mismatch vs reference (max err {max_err})"
    print("KERNEL_OK")
</pallas_src>

<mosaic_0001>
module attributes {stable_mosaic.version = 11 : i64} {
  func.func @_fnet_kernel(%arg0: i32, %arg1: memref<16x8xf32, #tpu.memory_space<vmem>>, %arg2: memref<16x1xf32, #tpu.memory_space<vmem>>, %arg3: memref<8x16xf32, #tpu.memory_space<vmem>>, %arg4: memref<1x16xf32, #tpu.memory_space<vmem>>, %arg5: memref<16x1024xf32, #tpu.memory_space<vmem>>, %arg6: memref<1x1024xf32, #tpu.memory_space<vmem>>, %arg7: memref<16x1024xbf16, #tpu.memory_space<vmem>>) attributes {dimension_semantics = [#tpu.dimension_semantics<parallel>], iteration_bounds = array<i64: 3>, scalar_prefetch = 0 : i64, scratch_operands = 0 : i64, tpu.core_type = #tpu.core_type<tc>, window_params = [{transform_indices = @transform_0, window_bounds = array<i64: 16, 8>}, {transform_indices = @transform_1, window_bounds = array<i64: 16, 1>}, {pipeline_mode = #tpu.pipeline_mode<synchronous>, transform_indices = @transform_2, window_bounds = array<i64: 8, 16>}, {pipeline_mode = #tpu.pipeline_mode<synchronous>, transform_indices = @transform_3, window_bounds = array<i64: 1, 16>}, {pipeline_mode = #tpu.pipeline_mode<synchronous>, transform_indices = @transform_4, window_bounds = array<i64: 16, 1024>}, {pipeline_mode = #tpu.pipeline_mode<synchronous>, transform_indices = @transform_5, window_bounds = array<i64: 1, 1024>}, {transform_indices = @transform_6, window_bounds = array<i64: 16, 1024>}]} {
    %c0 = arith.constant 0 : index
    %c0_0 = arith.constant 0 : index
    %0 = vector.load %arg1[%c0, %c0_0] : memref<16x8xf32, #tpu.memory_space<vmem>>, vector<16x8xf32>
    %c0_1 = arith.constant 0 : index
    %c0_2 = arith.constant 0 : index
    %1 = vector.load %arg3[%c0_1, %c0_2] : memref<8x16xf32, #tpu.memory_space<vmem>>, vector<8x16xf32>
    %cst = arith.constant dense<0.000000e+00> : vector<16x16xf32>
    %2 = tpu.matmul %0, %1, %cst {dimension_numbers = #tpu.dot_dimension_numbers<[1], [0], [0], [1], [0, 0, 1, 1], [], []>} : vector<16x8xf32>, vector<8x16xf32>, vector<16x16xf32> -> vector<16x16xf32>
    %c0_3 = arith.constant 0 : index
    %c0_4 = arith.constant 0 : index
    %3 = vector.load %arg4[%c0_3, %c0_4] : memref<1x16xf32, #tpu.memory_space<vmem>>, vector<1x16xf32>
    %4 = vector.broadcast %3 : vector<1x16xf32> to vector<16x16xf32>
    %5 = arith.addf %2, %4 : vector<16x16xf32>
    %cst_5 = arith.constant 0.000000e+00 : f32
    %6 = vector.broadcast %cst_5 : f32 to vector<16x16xf32>
    %7 = arith.maximumf %5, %6 : vector<16x16xf32>
    %c0_6 = arith.constant 0 : index
    %c0_7 = arith.constant 0 : index
    %8 = vector.load %arg5[%c0_6, %c0_7] : memref<16x1024xf32, #tpu.memory_space<vmem>>, vector<16x1024xf32>
    %cst_8 = arith.constant dense<0.000000e+00> : vector<16x1024xf32>
    %9 = tpu.matmul %7, %8, %cst_8 {dimension_numbers = #tpu.dot_dimension_numbers<[1], [0], [0], [1], [0, 0, 1, 1], [], []>} : vector<16x16xf32>, vector<16x1024xf32>, vector<16x1024xf32> -> vector<16x1024xf32>
    %c0_9 = arith.constant 0 : index
    %c0_10 = arith.constant 0 : index
    %10 = vector.load %arg6[%c0_9, %c0_10] : memref<1x1024xf32, #tpu.memory_space<vmem>>, vector<1x1024xf32>
    %11 = vector.broadcast %10 : vector<1x1024xf32> to vector<16x1024xf32>
    %12 = arith.addf %9, %11 : vector<16x1024xf32>
    %c0_11 = arith.constant 0 : index
    %c0_12 = arith.constant 0 : index
    %13 = vector.load %arg2[%c0_11, %c0_12] : memref<16x1xf32, #tpu.memory_space<vmem>>, vector<16x1xf32>
    %14 = vector.broadcast %13 : vector<16x1xf32> to vector<16x1024xf32>
    %15 = arith.mulf %12, %14 : vector<16x1024xf32>
    %16 = arith.truncf %15 : vector<16x1024xf32> to vector<16x1024xbf16>
    %c0_13 = arith.constant 0 : index
    %c0_14 = arith.constant 0 : index
    %17 = vector.load %arg7[%c0_13, %c0_14] : memref<16x1024xbf16, #tpu.memory_space<vmem>>, vector<16x1024xbf16>
    tpu.vector_store %arg7[%c0_13, %c0_14], %16 {strides = array<i32>} : memref<16x1024xbf16, #tpu.memory_space<vmem>>, vector<16x1024xbf16>,
    return
  }
  func.func @transform_0(%arg0: i32) -> (i32, i32) {
    %c0_i32 = arith.constant 0 : i32
    %c0_i32_0 = arith.constant 0 : i32
    return %arg0, %c0_i32 : i32, i32
  }
  func.func @transform_1(%arg0: i32) -> (i32, i32) {
    %c0_i32 = arith.constant 0 : i32
    %c0_i32_0 = arith.constant 0 : i32
    return %arg0, %c0_i32 : i32, i32
  }
  func.func @transform_2(%arg0: i32) -> (i32, i32) {
    %c0_i32 = arith.constant 0 : i32
    %c0_i32_0 = arith.constant 0 : i32
    %c0_i32_1 = arith.constant 0 : i32
    return %c0_i32, %c0_i32_0 : i32, i32
  }
  func.func @transform_3(%arg0: i32) -> (i32, i32) {
    %c0_i32 = arith.constant 0 : i32
    %c0_i32_0 = arith.constant 0 : i32
    %c0_i32_1 = arith.constant 0 : i32
    return %c0_i32, %c0_i32_0 : i32, i32
  }
  func.func @transform_4(%arg0: i32) -> (i32, i32) {
    %c0_i32 = arith.constant 0 : i32
    %c0_i32_0 = arith.constant 0 : i32
    %c0_i32_1 = arith.constant 0 : i32
    return %c0_i32, %c0_i32_0 : i32, i32
  }
  func.func @transform_5(%arg0: i32) -> (i32, i32) {
    %c0_i32 = arith.constant 0 : i32
    %c0_i32_0 = arith.constant 0 : i32
    %c0_i32_1 = arith.constant 0 : i32
    return %c0_i32, %c0_i32_0 : i32, i32
  }
  func.func @transform_6(%arg0: i32) -> (i32, i32) {
    %c0_i32 = arith.constant 0 : i32
    %c0_i32_0 = arith.constant 0 : i32
    return %arg0, %c0_i32 : i32, i32
  }
}

</mosaic_0001>

<bundles_post_ra>
// kernel: tpu_custom_call.1
= control target key start
LH: loop header
LB: loop body
LE: loop exit
PB: predicated region body
PF: predicated region fallthrough
CT: control target
= control target key end

     0   :  { %11 = vsyncpa [#allocation3], 0  ;;  %s1387_s0 = inlined_call_operand.vmem [shape: f32[48,8], index: 0, kind: input, shape index: {}]   ;;  %s1388_s1 = inlined_call_operand.vmem [shape: f32[48,1], index: 1, kind: input, shape index: {}]   ;;  %s1389_s2 = inlined_call_operand.vmem [shape: f32[8,16], index: 2, kind: input, shape index: {}]   ;;  %s1390_s3 = inlined_call_operand.vmem [shape: f32[1,16], index: 3, kind: input, shape index: {}]   ;;  %s1391_s4 = inlined_call_operand.hbm [shape: f32[16,1024], index: 4, kind: input, shape index: {}]   ;;  %s1392_s5 = inlined_call_operand.vmem [shape: f32[1,1024], index: 5, kind: input, shape index: {}]   ;;  %s1393_s6 = inlined_call_operand.hbm [shape: bf16[48,1024], index: 6, kind: output, shape index: {}]  }
   0x1   :  { %12 = vsyncpa [#allocation4], 0 }
   0x2   :  { %14 = vsyncpa [#allocation4 + $0x1], 0  ;;  %s1208_s21 = smov 0   ;;  %s1210_s22 = smov 0  }
   0x3   :  { %s1212_s23 = smov 0   ;;  %s1214_s24 = smov 0  }
   0x4 LB: > { %s1229_s25 = sadd.s32 4294967295, %s1163_s24   ;;  %s942_s26 = sadd.s32 4294967294, %s1163_s24   ;;  %s1163_s24 = sphi %s1214_s24, %s1409_s24   ;;  %s1159_s23 = sphi %s1212_s23, %s1408_s23   ;;  %s1155_s22 = sphi %s1210_s22, %s1407_s22   ;;  %s1151_s21 = sphi %s1208_s21, %s1406_s21  }
   0x5   : > { %s1233_s27 = sadd.s32 1, %s1163_s24   ;;  %s163_s28 = sadd.s32 1, %s1159_s23 }
   0x6   : > { %s160_s29 = ssub.s32 %s1163_s24, %s1233_s27  ;;  %p173_p0 = scmp.ne.s32.totalorder %s1159_s23, %s1155_s22 }
   0x7   : > { %p161_p1 = scmp.eq.s32.totalorder %s160_s29, 0  ;;  %p174_p2 = scmp.eq.s32.totalorder %s1229_s25, 2 }
   0x8   : > { %p179_p3 = scmp.ne.s32.totalorder %s1155_s22, %s1151_s21  ;;  %p180_p4 = scmp.eq.s32.totalorder %s942_s26, 2 }
   0x9   : > { %s1244_s30 = scalar_select %p161_p1, %s1159_s23, %s163_s28  }
   0xa   : > { %p1246_p5 = por %p174_p2, %p173_p0  ;;  %p1250_p6 = por %p180_p4, %p179_p3 }
   0xb   : > { %p943_p7 = scmp.ge.s32.totalorder %s1163_s24, 1  ;;  %p187_p8 = scmp.lt.s32.totalorder %s1163_s24, 4 }
   0xc   : > { %s1397_s7 = scalar_select %p1246_p5, 1, 0 }
   0xd   : > { %s1398_s8 = scalar_select %p1250_p6, 1, 0 }
   0xe   : > { %p1394_p9 = scmp.eq.s32.totalorder %s1229_s25, 0  ;;  %p1257_p10 = pnand %p943_p7, %p187_p8 }
   0xf   : > { %s1165_s10 = smov [#allocation2]   ;;  %s1069_s15 = scalar_lea.hbm %s1391_s4, 2048 }
  0x10   : > { %s1399_s9 = scalar_select %p1257_p10, 1, 0 }
  0x11   : > { %s205_s11 = sshll.u32 %s1165_s10, 4  ;;  %p1018_p11 = pneg %p1257_p10  ;;  %s206_s11 = int_to_ptr.vmem [resolvable:$true] %s205_s11 }
  0x12   : > { %p1070_p13 = scmp.ne.s32.totalorder %s1391_s4, %s1069_s15  ;;  %p1076_p3 = scmp.lt.u32.totalorder %s1069_s15, %s1391_s4 }
  0x13   : > { %p1265_p12 = pnand %p1394_p9, %p1018_p11 }
  0x15   : > { %p1071_p0 = pneg %p1265_p12 }
  0x17   : > { %p1072_p1 = pnand %p1071_p0, %p1070_p13 }
  0x19   : > { %p1073_p2 = pneg %p1072_p1 }
  0x1b   : > { %p1078_p4 = pnand %p1076_p3, %p1073_p2 }
  0x1d   : > { %1081 = shalt.err (!%p1078_p4)
}
  0x1e   : > { %s1082_s20 = scalar_lea.vmem %s206_s11, 2048  ;;  %p1090_p9 = scmp.lt.s32.totalorder %s206_s11, %s206_s11 }
  0x1f   : > { %p1083_p7 = scmp.ne.s32.totalorder %s206_s11, %s1082_s20  ;;  %p1091_p6 = scmp.lt.s32.totalorder %s1082_s20, %s1082_s20 }
  0x21   : > { %p1085_p8 = pnand %p1083_p7, %p1071_p0  ;;  %p1092_p5 = por %p1091_p6, %p1090_p9 }
  0x23   : > { %p1086_p11 = pneg %p1085_p8 }
  0x25   : > { %p1093_p10 = pnand %p1092_p5, %p1086_p11 }
  0x27   : > { %1096 = shalt.err (!%p1093_p10)
}
  0x28   : > { %s1166_s26 = smov 1024   ;;  %s1167_s28 = smov 64  }
  0x29   : > { %1021 = dma.hbm_to_vmem [thread:$0]  (!%p1265_p12), %s1391_s4, 2048, %s206_s11, [#allocation3], %s1166_s26, %s1166_s26, %s1167_s28  }
  0x2a   : > { %p1401_p13 = scmp.ne.s32.totalorder %s1399_s9, 0 }
  0x2b   : > { %p1402_p1 = scmp.eq.s32.totalorder (!%p1401_p13), %s1229_s25, 0 }
  0x2c   : > { %242 = sbr.rel (%p1401_p13) target bundleno = 523 (0x20b), region = 44 }
  0x33   : > { %1142 = dma.done.wait (%p1402_p1), [#allocation3], 2048   ;;  %p1403_p0 = pmov %p1402_p1 }
  0x34   : > { %s949_s13 = sshll.u32 %s1229_s25, 1  ;;  %vm300_vm0 = vcmask 64512   ;;  %v292_v0 = vld [vmem:[%s1389_s2] sm:$0xff]  ;;  %v385_v3 = vld [vmem:[#allocation2 + $0x8] sm:$0xff]  ;;  %v387_v5 = vld [vmem:[#allocation2 + $0x18] sm:$0xff]  ;;  %v1168_v18 = vmov 0.0   ;;  %v402_v38 = vlaneseq }
  0x35   : > { %1144 = vsyncadd (%p1403_p0), [#allocation3], 4294965248  ;;  %p278_p5 = scmp.lt.s32.totalorder %s949_s13, 5  ;;  %991 = vmatprep.subr.mxu0 %v292_v0  ;;  %v393_v4 = vld [vmem:[#allocation2 + $0x48] sm:$0xff]  ;;  %v395_v7 = vld [vmem:[#allocation2 + $0x58] sm:$0xff]  ;;  %513 = vmatprep.mubr.f32.mxu1 %v1168_v18  ;;  %v1169_v22 = vmov 0  }
  0x36   : > { %992 = vmatpush3.msra.mxu0 %v292_v0  ;;  %v996_v6 = vpack.c.bf16 %v393_v4, %v385_v3  ;;  %v384_v8 = vld [vmem:[#allocation2] sm:$0xff]  ;;  %v1000_v9 = vpack.c.bf16 %v395_v7, %v387_v5  ;;  %v386_v11 = vld [vmem:[#allocation2 + $0x10] sm:$0xff]  ;;  %v389_v15 = vld [vmem:[#allocation2 + $0x28] sm:$0xff]  ;;  %1068 = vset.pattern.permute.xlu0 %v1169_v22  ;;  %vm442_vm1 = vcmask 130048   ;;  %v403_v39 = vshrl.u32 %v402_v38, 7  ;;  %s274_s10 = sand.u32 1, %s1155_s22  }
  0x37   : > { %s1411_s13 = smov (!%p278_p5, %s949_s13), 5  ;;  %v392_v10 = vld [vmem:[#allocation2 + $0x40] sm:$0xff]  ;;  %v394_v12 = vld [vmem:[#allocation2 + $0x50] sm:$0xff]  ;;  %v397_v16 = vld [vmem:[#allocation2 + $0x68] sm:$0xff]  ;;  %s987_s11 = sshll.u32 %s1229_s25, 10 }
  0x38   : > { %s950_s12 = sshll.u32 %s1411_s13, 3  ;;  %997 = vmatprep.subr.bf16.mxu1 %v996_v6  ;;  %v998_v13 = vpack.c.bf16 %v392_v10, %v384_v8  ;;  %v1002_v14 = vpack.c.bf16 %v394_v12, %v386_v11  ;;  %1001 = vmatprep.subr.bf16.mxu0 %v1000_v9  ;;  %v391_v17 = vld [vmem:[#allocation2 + $0x38] sm:$0xff]  ;;  %v1004_v19 = vpack.c.bf16 %v397_v16, %v389_v15  ;;  %v953_v25 = vld [vmem:[%s1390_s3] ss:$0 sm:$0xff]  ;;  %v388_v26 = vld [vmem:[#allocation2 + $0x20] sm:$0xff]  ;;  %v404_v40 = vsub.s32 0, %v403_v39  ;;  %s1338_s16 = scalar_lea.hbm %s1393_s6, %s987_s11 }
  0x39   : > { %s281_s9 = scalar_lea.vmem %s1387_s0, %s950_s12  ;;  %v399_v20 = vld [vmem:[#allocation2 + $0x78] sm:$0xff]  ;;  %s287_s19 = scalar_lea.vmem %s1388_s1, %s950_s12  ;;  %v396_v28 = vld [vmem:[#allocation2 + $0x60] sm:$0xff]  ;;  %v390_v29 = vld [vmem:[#allocation2 + $0x30] sm:$0xff]  ;;  %v412_v41 = vsub.s32 2, %v403_v39  ;;  %v408_v43 = vsub.s32 1, %v403_v39  ;;  %v416_v44 = vsub.s32 3, %v403_v39 }
  0x3a   : > { %v290_v1 = vld [vmem:[%s281_s9] sm:$0xff]  ;;  %v291_v2 = vld [vmem:[%s281_s9 + $0x8] sm:$0xff]  ;;  %999 = vmatpush1.bf16.msra.mxu1 %v998_v13  ;;  %v1008_v21 = vpack.c.bf16 %v399_v20, %v391_v17  ;;  %v1006_v33 = vpack.c.bf16 %v396_v28, %v388_v26  ;;  %v420_v52 = vsub.s32 4, %v403_v39  ;;  %v428_v53 = vsub.s32 6, %v403_v39  ;;  %s948_s13 = sshll.u32 %s274_s10, 6  ;;  %s1346_s25 = scalar_lea.sflag [#allocation4], %s274_s10 }
  0x3b   : > { %993 = vmatprep.mubr.msk.f32.mxu0 %vm300_vm0, %v290_v1  ;;  %1005 = vmatprep.subr.bf16.mxu1 %v1004_v19  ;;  %v757_v23 = vld [vmem:[%s287_s19] sm:$0xff]  ;;  %v758_v24 = vld [vmem:[%s287_s19 + $0x8] sm:$0xff]  ;;  %v424_v58 = vsub.s32 5, %v403_v39  ;;  %v432_v59 = vsub.s32 7, %v403_v39  ;;  %s1325_s12 = scalar_lea.vmem [#allocation5], %s948_s13  ;;  %p1404_p9 = scmp.ne.s32.totalorder %s1397_s7, 0 }
  0x3c   : > { %994 = vmatmul.mubr.msk.f32.vlgmr.msra.gmra.mrb[0].mxu0 %vm300_vm0, %v291_v2  ;;  %761 = vperm.xlu0 %1068, %v757_v23   ;;  %v398_v30 = vld [vmem:[#allocation2 + $0x70] sm:$0xff]  ;;  %s856_s14 = sshll.u32 %s1325_s12, 4  ;;  %s1170_s18 = smov [#allocation5]   ;;  %s1340_s14 = int_to_ptr.vmem [resolvable:$true] %s856_s14 }
  0x3d   : > { %1003 = vmatpush1.bf16.msra.mxu0 %v1002_v14  ;;  %590 = vmatprep.mubr.f32.mxu0 %v1168_v18  ;;  %v1010_v34 = vpack.c.bf16 %v398_v30, %v390_v29  ;;  %v400_v42 = vld [vmem:[%s1392_s5] sm:$0xff]  ;;  %s1097_s17 = scalar_lea.vmem %s1340_s14, 1024  ;;  %s1101_s19 = sshll.u32 %s1170_s18, 4  ;;  %s1102_s19 = int_to_ptr.vmem [resolvable:$false] %s1101_s19 }
  0x3e   : > { %1009 = vmatprep.subr.bf16.mxu0 %v1008_v21  ;;  %v405_v45 = vrot.slane %v400_v42, %v404_v40  ;;  %v413_v46 = vrot.slane %v400_v42, %v412_v41  ;;  %v409_v48 = vrot.slane %v400_v42, %v408_v43  ;;  %v417_v49 = vrot.slane %v400_v42, %v416_v44  ;;  %p1098_p6 = scmp.ne.s32.totalorder %s1340_s14, %s1097_s17  ;;  %s1103_s20 = scalar_lea.vmem %s1102_s19, 2048 }
  0x3f   : > { %v421_v5 = vrot.slane %v400_v42, %v420_v52  ;;  %v429_v6 = vrot.slane %v400_v42, %v428_v53  ;;  %v425_v11 = vrot.slane %v400_v42, %v424_v58  ;;  %v433_v12 = vrot.slane %v400_v42, %v432_v59  ;;  %p1104_p2 = scmp.lt.s32.totalorder %s1340_s14, %s1102_s19  ;;  %p1105_p3 = scmp.lt.s32.totalorder %s1103_s20, %s1097_s17 }
  0x40   : > { %766 = vperm.xlu0 %1068, %v758_v24   ;;  %p1099_p10 = pnand %p1098_p6, %p1404_p9 }
  0x41   : > { %p1106_p4 = por %p1105_p3, %p1104_p2 }
  0x42   : > { %p1100_p12 = pneg %p1099_p10 }
  0x44   : > { %p1107_p7 = pnand %p1106_p4, %p1100_p12 }
  0xbb   : > { %v762_v47 = vpop.permute.xlu0 %761 }
  0xbf   : > { %v767_v0 = vpop.permute.xlu0 %766 }
 0x10f   : > { %v995_v27 = vpop.f32.mrb[0].mxu0 }
 0x110   : > { %v373_v31 = vpop.f32.mrb[1].mxu0  ;;  %v379_v35 = vadd.f32 %v995_v27, %v953_v25 }
 0x111   : > { %v374_v32 = vadd.f32 %v953_v25, %v373_v31 }
 0x112   : > { %v383_v37 = vmax.f32 %v379_v35, 0.0 }
 0x113   : > { %v382_v36 = vmax.f32 %v374_v32, 0.0 }
 0x115   : > { %956 = vmatmul.mubr.msk.f32.vlgmr.msra.gmra.mrb[0].mxu1 %vm442_vm1, %v382_v36  ;;  %958 = vmatmul.mubr.msk.f32.vlgmr.msra.gmra.mrb[2].mxu0 %vm442_vm1, %v382_v36 }
 0x116   : > { %1007 = vmatpush1.bf16.msra.mxu1 %v1006_v33  ;;  %1011 = vmatpush1.bf16.msra.mxu0 %v1010_v34 }
 0x117   : > { %519 = vmatprep.mubr.f32.mxu1 %v1168_v18  ;;  %596 = vmatprep.mubr.f32.mxu0 %v1168_v18 }
 0x119   : > { %957 = vmatmul.mubr.msk.f32.gmra.mrb[2].mxu1 %vm442_vm1, %v383_v37  ;;  %959 = vmatmul.mubr.msk.f32.gmra.mrb[4].mxu0 %vm442_vm1, %v383_v37 }
 0x11a   : > { %667 = vmatprep.mubr.f32.mxu1 %v1168_v18  ;;  %744 = vmatprep.mubr.f32.mxu0 %v1168_v18 }
 0x11d   : > { %960 = vmatmul.mubr.msk.f32.vlgmr.msra.gmra.mrb[4].mxu1 %vm442_vm1, %v382_v36  ;;  %962 = vmatmul.mubr.msk.f32.vlgmr.msra.gmra.mrb[6].mxu0 %vm442_vm1, %v382_v36 }
 0x11e   : > { %673 = vmatprep.mubr.f32.mxu1 %v1168_v18  ;;  %750 = vmatprep.mubr.f32.mxu0 %v1168_v18 }
 0x121   : > { %961 = vmatmul.mubr.msk.f32.gmra.mrb[6].mxu1 %vm442_vm1, %v383_v37  ;;  %963 = vmatmul.mubr.msk.f32.gmra.mrb[8].mxu0 %vm442_vm1, %v383_v37 }
 0x1e8   : > { %v515_v50 = vpop.f32.mrb[0].mxu1  ;;  %v592_v51 = vpop.f32.mrb[2].mxu0 }
 0x1e9   : > { %v516_v54 = vadd.f32 %v515_v50, %v405_v45  ;;  %v593_v55 = vadd.f32 %v592_v51, %v413_v46  ;;  %v517_v56 = vpop.f32.mrb[1].mxu1  ;;  %v594_v57 = vpop.f32.mrb[3].mxu0 }
 0x1ea   : > { %v518_v60 = vadd.f32 %v517_v56, %v409_v48  ;;  %v595_v61 = vadd.f32 %v594_v57, %v417_v49 }
 0x1eb   : > { %v769_v62 = vmul.f32 %v762_v47, %v516_v54  ;;  %v771_v63 = vmul.f32 %v762_v47, %v593_v55 }
 0x1ec   : > { %v770_v1 = vmul.f32 %v762_v47, %v518_v60  ;;  %v772_v2 = vmul.f32 %v762_v47, %v595_v61  ;;  %v521_v3 = vpop.f32.mrb[2].mxu1  ;;  %v598_v4 = vpop.f32.mrb[4].mxu0 }
 0x1ed   : > { %v522_v7 = vadd.f32 %v521_v3, %v405_v45  ;;  %v599_v8 = vadd.f32 %v598_v4, %v413_v46  ;;  %v523_v9 = vpop.f32.mrb[3].mxu1  ;;  %v600_v10 = vpop.f32.mrb[5].mxu0 }
 0x1ee   : > { %v978_v13 = vpack.c.bf16 %v770_v1, %v769_v62  ;;  %v979_v14 = vpack.c.bf16 %v772_v2, %v771_v63  ;;  %v524_v15 = vadd.f32 %v523_v9, %v409_v48  ;;  %v601_v16 = vadd.f32 %v600_v10, %v417_v49 }
 0x1ef   : > { %v777_v17 = vmul.f32 %v767_v0, %v522_v7  ;;  %v779_v18 = vmul.f32 %v767_v0, %v599_v8 }
 0x1f0   : > { %833 = vst [vmem:[%s1325_s12] sm:$0xff] %v978_v13  ;;  %834 = vst [vmem:[%s1325_s12 + $0x8] sm:$0xff] %v979_v14  ;;  %v778_v19 = vmul.f32 %v767_v0, %v524_v15  ;;  %v780_v20 = vmul.f32 %v767_v0, %v601_v16  ;;  %v669_v21 = vpop.f32.mrb[4].mxu1  ;;  %v746_v22 = vpop.f32.mrb[6].mxu0 }
 0x1f1   : > { %v670_v23 = vadd.f32 %v669_v21, %v421_v5  ;;  %v747_v24 = vadd.f32 %v746_v22, %v429_v6  ;;  %v671_v25 = vpop.f32.mrb[5].mxu1  ;;  %v748_v26 = vpop.f32.mrb[7].mxu0 }
 0x1f2   : > { %v982_v27 = vpack.c.bf16 %v778_v19, %v777_v17  ;;  %v983_v28 = vpack.c.bf16 %v780_v20, %v779_v18  ;;  %v672_v29 = vadd.f32 %v671_v25, %v425_v11  ;;  %v749_v30 = vadd.f32 %v748_v26, %v433_v12 }
 0x1f3   : > { %v773_v31 = vmul.f32 %v762_v47, %v670_v23  ;;  %v775_v32 = vmul.f32 %v762_v47, %v747_v24 }
 0x1f4   : > { %837 = vst [vmem:[%s1325_s12 + $0x20] sm:$0xff] %v982_v27  ;;  %838 = vst [vmem:[%s1325_s12 + $0x28] sm:$0xff] %v983_v28  ;;  %v774_v33 = vmul.f32 %v762_v47, %v672_v29  ;;  %v776_v34 = vmul.f32 %v762_v47, %v749_v30  ;;  %v675_v35 = vpop.f32.mrb[6].mxu1  ;;  %v752_v36 = vpop.f32.mrb[8].mxu0 }
 0x1f5   : > { %v676_v37 = vadd.f32 %v675_v35, %v421_v5  ;;  %v753_v38 = vadd.f32 %v752_v36, %v429_v6  ;;  %v677_v39 = vpop.f32.mrb[7].mxu1  ;;  %v754_v40 = vpop.f32.mrb[9].mxu0 }
 0x1f6   : > { %v980_v41 = vpack.c.bf16 %v774_v33, %v773_v31  ;;  %v981_v42 = vpack.c.bf16 %v776_v34, %v775_v32  ;;  %v678_v43 = vadd.f32 %v677_v39, %v425_v11  ;;  %v755_v44 = vadd.f32 %v754_v40, %v433_v12 }
 0x1f7   : > { %v781_v45 = vmul.f32 %v767_v0, %v676_v37  ;;  %v783_v46 = vmul.f32 %v767_v0, %v753_v38 }
 0x1f8   : > { %835 = vst [vmem:[%s1325_s12 + $0x10] sm:$0xff] %v980_v41  ;;  %836 = vst [vmem:[%s1325_s12 + $0x18] sm:$0xff] %v981_v42  ;;  %v782_v47 = vmul.f32 %v767_v0, %v678_v43  ;;  %v784_v48 = vmul.f32 %v767_v0, %v755_v44 }
 0x1fa   : > { %v984_v49 = vpack.c.bf16 %v782_v47, %v781_v45  ;;  %v985_v50 = vpack.c.bf16 %v784_v48, %v783_v46 }
 0x1fc   : > { %839 = vst [vmem:[%s1325_s12 + $0x30] sm:$0xff] %v984_v49  ;;  %840 = vst [vmem:[%s1325_s12 + $0x38] sm:$0xff] %v985_v50 }
 0x1fd   : > { %1110 = shalt.err (!%p1107_p7)
}
 0x1fe   : > { %s1111_s26 = scalar_lea.hbm %s1338_s16, 1024  ;;  %s1115_s10 = scalar_lea.hbm %s1393_s6, 3072 }
 0x1ff   : > { %p1112_p8 = scmp.ne.s32.totalorder %s1338_s16, %s1111_s26  ;;  %p1116_p1 = scmp.lt.u32.totalorder %s1338_s16, %s1393_s6 }
 0x200   : > { %p1117_p0 = scmp.lt.u32.totalorder %s1115_s10, %s1111_s26  ;;  %p1119_p6 = scmp.lt.u32.totalorder %s1111_s26, %s1338_s16 }
 0x201   : > { %p1113_p11 = pnand %p1112_p8, %p1404_p9 }
 0x202   : > { %p1118_p5 = por %p1117_p0, %p1116_p1 }
 0x203   : > { %p1114_p13 = pneg %p1113_p11 }
 0x204   : > { %p1120_p10 = por %p1119_p6, %p1118_p5 }
 0x206   : > { %p1121_p12 = pnand %p1120_p10, %p1114_p13 }
 0x208   : > { %1124 = shalt.err (!%p1121_p12)
}
 0x209   : > { %s1171_s11 = smov 512   ;;  %s1172_s9 = smov 32  }
 0x20a   : > { %1016 = dma.vmem_to_hbm [thread:$0]  (%p1404_p9), %s1340_s14, 1024, %s1338_s16, %s1346_s25, %s1171_s11, %s1171_s11, %s1172_s9  }
 0x20b PF: > { %p1028_p2 = scmp.ge.s32.totalorder %s1163_s24, 2  ;;  %s871_s15 = sand.u32 1, %s1151_s21  }
 0x20c   : > { %p1405_p3 = scmp.ne.s32.totalorder %s1398_s8, 0  ;;  %s872_s17 = scalar_lea.sflag [#allocation4], %s871_s15 }
 0x20e   : > { %p1023_p4 = pnand %p1028_p2, %p1405_p3 }
 0x210   : > { %1146 = dma.done.wait (!%p1023_p4), %s872_s17, 1024  }
 0x211   : > { %1148 = vsyncadd (!%p1023_p4), %s872_s17, 4294966272  ;;  %p17_p7 = scmp.ge.s32.totalorder %s1233_s27, 5   ;;  %s1406_s21 = smov %s1155_s22 }
 0x212   : > { %s1407_s22 = smov %s1159_s23  ;;  %s1408_s23 = smov %s1244_s30 }
 0x213   : > { %s1409_s24 = smov %s1233_s27  ;;  %19 = sbr.rel (!%p17_p7) target bundleno = 4 (0x4), region = 87 }
 0x21a   :  { %877 = vsyncpa [#allocation3], 1 }
 0x21b   :  { %879 = vsyncpa [#allocation3 + $0x1], 1 }
 0x21c   :  { %880 = vsyncpa [#allocation4], 1 }
 0x21d   :  { %882 = vsyncpa [#allocation4 + $0x1], 1 }

</bundles_post_ra>
